<compile_context>
chip_gen: v6e
topology: v6e:2x2x1
jax: 0.10.0
libtpu: 0.0.40
codegen_flags: <defaults>
</compile_context>

<pallas_src>
from functools import partial

import jax
import jax.numpy as jnp
from jax.experimental import pallas as pl
from jax.experimental.pallas import tpu as pltpu


def _round_up(n, m):
    return ((n + m - 1) // m) * m


def _vmem_capacity_bytes():
    try:
        info = pltpu.get_tpu_info()
        cap = getattr(info, "vmem_capacity_bytes", None)
        if cap:
            return int(cap)
    except Exception:
        pass
    return 64 << 20  # conservative: v7x per-TensorCore VMEM


_VMEM_CAP = _vmem_capacity_bytes()


def resfc_kernel(x_ref, w1_ref, b1_ref, w2_ref, b2_ref, w3_ref, b3_ref, o_ref):
    wdtype = w1_ref.dtype
    x = x_ref[...]                          # (TM, C_in) float32 (original precision)
    xw = x.astype(wdtype)                   # matmul operand dtype (bf16 or f32)

    # fcM: Linear -> ReLU -> Linear -> ReLU   (f32 accumulation on the MXU)
    h1 = jnp.dot(xw, w1_ref[...], preferred_element_type=jnp.float32) + b1_ref[...]
    h1 = jnp.maximum(h1, 0.0)

    h2 = jnp.dot(h1.astype(wdtype), w2_ref[...],
                 preferred_element_type=jnp.float32) + b2_ref[...]
    h2 = jnp.maximum(h2, 0.0)

    # residual add + ReLU in f32 with the *original* f32 x, then fc + ReLU
    r = jnp.maximum(x + h2, 0.0)
    y = jnp.dot(r.astype(wdtype), w3_ref[...],
                preferred_element_type=jnp.float32) + b3_ref[...]
    o_ref[...] = jnp.maximum(y, 0.0).astype(o_ref.dtype)


def prepare_params(params, compute_dtype=jnp.bfloat16):
    """One-time parameter prep: cast matmul weights to the compute dtype
    (default bf16 for native MXU rate on v5e/v6e/v7x); biases stay f32 and are
    added to the f32 accumulators directly.  Weights are stored transposed
    (in_features, out_features); biases (1, out_features)."""
    cdt = jnp.dtype(compute_dtype)
    return {
        "w1": params["w1"].astype(cdt),
        "w2": params["w2"].astype(cdt),
        "w3": params["w3"].astype(cdt),
        "b1": params["b1"].reshape(1, -1).astype(jnp.float32),
        "b2": params["b2"].reshape(1, -1).astype(jnp.float32),
        "b3": params["b3"].reshape(1, -1).astype(jnp.float32),
    }


@partial(jax.jit, static_argnames=("tm",))
def resfc_forward(x, prep, tm=512):
    """x: (B, C_in) -> (B, C_out) float32."""
    B, C_in = x.shape
    C_out = prep["w3"].shape[1]
    x = x.astype(jnp.float32)

    # Batch tiling: multiples of 8 sublanes; ensure >=2 tiles when possible so the
    # "parallel" batch axis can be sharded across v7x's two TensorCores.
    b8 = _round_up(max(B, 8), 8)
    TM = min(tm, b8)
    if b8 >= 16:
        TM = min(TM, _round_up((b8 + 1) // 2, 8))
    TM = _round_up(max(TM, 8), 8)
    b_pad = _round_up(b8, TM)

    xp = x if b_pad == B else jnp.zeros((b_pad, C_in), jnp.float32).at[:B].set(x)

    grid = (b_pad // TM,)

    # x / out: tiled over the batch axis, last dim equals the full array dim
    # (legal and avoids HBM padding/write amplification for small C).
    x_spec = pl.BlockSpec((TM, C_in), lambda i: (i, 0))
    o_spec = pl.BlockSpec((TM, C_out), lambda i: (i, 0))

    # Weights/biases: VMEM-resident (constant index_map), single-buffered.
    def resident(shape):
        return pl.BlockSpec(shape, lambda i: (0, 0), pipeline_mode=pl.Buffered(1))

    # Honest VMEM budget: single-buffered weights + f32 biases + double-buffered
    # x/out tiles + f32 intermediates (h1/h2/r), with 2x headroom, capped below
    # the per-core VMEM capacity.
    itemsize = jnp.dtype(prep["w1"].dtype).itemsize
    wbytes = (prep["w1"].size + prep["w2"].size + prep["w3"].size) * itemsize
    bbytes = (prep["b1"].size + prep["b2"].size + prep["b3"].size) * 4
    io_bytes = 2 * (TM * C_in + TM * C_out) * 4
    live_bytes = 3 * TM * C_in * 4
    need = wbytes + bbytes + io_bytes + live_bytes
    vmem_limit = int(min(_VMEM_CAP - (8 << 20), max(32 << 20, 2 * need)))

    out = pl.pallas_call(
        resfc_kernel,
        out_shape=jax.ShapeDtypeStruct((b_pad, C_out), jnp.float32),
        grid=grid,
        in_specs=[
            x_spec,
            resident(prep["w1"].shape), resident(prep["b1"].shape),
            resident(prep["w2"].shape), resident(prep["b2"].shape),
            resident(prep["w3"].shape), resident(prep["b3"].shape),
        ],
        out_specs=o_spec,
        compiler_params=pltpu.CompilerParams(
            dimension_semantics=("parallel",),
            vmem_limit_bytes=vmem_limit,
        ),
    )(xp, prep["w1"], prep["b1"], prep["w2"], prep["b2"], prep["w3"], prep["b3"])

    return out[:B]


def init_params(key, in_channels, out_channels):
    """PyTorch-Linear-like uniform init; weights stored transposed (in, out)."""
    ks = jax.random.split(key, 6)

    def linear(kw, kb, fan_in, fan_out):
        bound = 1.0 / jnp.sqrt(fan_in)
        w = jax.random.uniform(kw, (fan_in, fan_out), jnp.float32, -bound, bound)
        b = jax.random.uniform(kb, (1, fan_out), jnp.float32, -bound, bound)
        return w, b

    w1, b1 = linear(ks[0], ks[1], in_channels, in_channels)
    w2, b2 = linear(ks[2], ks[3], in_channels, in_channels)
    w3, b3 = linear(ks[4], ks[5], in_channels, out_channels)
    return {"w1": w1, "b1": b1, "w2": w2, "b2": b2, "w3": w3, "b3": b3}


def resfc_reference(x, p):
    """Pure-JAX reference mirroring the PyTorch forward exactly."""
    h = jnp.maximum(x @ p["w1"] + p["b1"], 0.0)
    h = jnp.maximum(h @ p["w2"] + p["b2"], 0.0)
    r = jnp.maximum(x + h, 0.0)
    return jnp.maximum(r @ p["w3"] + p["b3"], 0.0)


if __name__ == "__main__":
    batch, in_channels, out_channels = 8, 32, 16

    key = jax.random.PRNGKey(0)
    k_x, k_p, k_x2 = jax.random.split(key, 3)
    x = jax.random.normal(k_x, (batch, in_channels), jnp.float32)
    params = init_params(k_p, in_channels, out_channels)
    ref = resfc_reference(x, params)

    # f32-weight path: exact (no padding anywhere, f32 accumulation).
    prep_f32 = prepare_params(params, compute_dtype=jnp.float32)
    out = jax.block_until_ready(resfc_forward(x, prep_f32))
    assert out.shape == (batch, out_channels)
    assert jnp.allclose(out, ref, atol=1e-5, rtol=1e-5)

    # Default bf16-operand path (f32 accumulation, f32 residual): looser tolerance.
    prep_bf16 = prepare_params(params)
    out_bf16 = jax.block_until_ready(resfc_forward(x, prep_bf16))
    assert out_bf16.shape == (batch, out_channels)
    assert jnp.allclose(out_bf16, ref, atol=5e-2, rtol=5e-2)

    # Larger batch exercising multiple grid tiles + batch padding.
    x2 = jax.random.normal(k_x2, (260, in_channels), jnp.float32)
    out2 = jax.block_until_ready(resfc_forward(x2, prep_f32, tm=128))
    assert out2.shape == (260, out_channels)
    assert jnp.allclose(out2, resfc_reference(x2, params), atol=1e-5, rtol=1e-5)

    print("KERNEL_OK")
</pallas_src>

<mosaic_0001>
module attributes {stable_mosaic.version = 11 : i64} {
  func.func @resfc_kernel(%arg0: i32, %arg1: memref<8x32xf32, #tpu.memory_space<vmem>>, %arg2: memref<32x32xf32, #tpu.memory_space<vmem>>, %arg3: memref<1x32xf32, #tpu.memory_space<vmem>>, %arg4: memref<32x32xf32, #tpu.memory_space<vmem>>, %arg5: memref<1x32xf32, #tpu.memory_space<vmem>>, %arg6: memref<32x16xf32, #tpu.memory_space<vmem>>, %arg7: memref<1x16xf32, #tpu.memory_space<vmem>>, %arg8: memref<8x16xf32, #tpu.memory_space<vmem>>) attributes {dimension_semantics = [#tpu.dimension_semantics<parallel>], iteration_bounds = array<i64: 1>, scalar_prefetch = 0 : i64, scratch_operands = 0 : i64, tpu.core_type = #tpu.core_type<tc>, window_params = [{transform_indices = @transform_0, window_bounds = array<i64: 8, 32>}, {pipeline_mode = #tpu.pipeline_mode<synchronous>, transform_indices = @transform_1, window_bounds = array<i64: 32, 32>}, {pipeline_mode = #tpu.pipeline_mode<synchronous>, transform_indices = @transform_2, window_bounds = array<i64: 1, 32>}, {pipeline_mode = #tpu.pipeline_mode<synchronous>, transform_indices = @transform_3, window_bounds = array<i64: 32, 32>}, {pipeline_mode = #tpu.pipeline_mode<synchronous>, transform_indices = @transform_4, window_bounds = array<i64: 1, 32>}, {pipeline_mode = #tpu.pipeline_mode<synchronous>, transform_indices = @transform_5, window_bounds = array<i64: 32, 16>}, {pipeline_mode = #tpu.pipeline_mode<synchronous>, transform_indices = @transform_6, window_bounds = array<i64: 1, 16>}, {transform_indices = @transform_7, window_bounds = array<i64: 8, 16>}]} {
    %c0 = arith.constant 0 : index
    %c0_0 = arith.constant 0 : index
    %0 = vector.load %arg1[%c0, %c0_0] : memref<8x32xf32, #tpu.memory_space<vmem>>, vector<8x32xf32>
    %c0_1 = arith.constant 0 : index
    %c0_2 = arith.constant 0 : index
    %1 = vector.load %arg2[%c0_1, %c0_2] : memref<32x32xf32, #tpu.memory_space<vmem>>, vector<32x32xf32>
    %cst = arith.constant dense<0.000000e+00> : vector<8x32xf32>
    %2 = tpu.matmul %0, %1, %cst {dimension_numbers = #tpu.dot_dimension_numbers<[1], [0], [0], [1], [0, 0, 1, 1], [], []>} : vector<8x32xf32>, vector<32x32xf32>, vector<8x32xf32> -> vector<8x32xf32>
    %c0_3 = arith.constant 0 : index
    %c0_4 = arith.constant 0 : index
    %3 = vector.load %arg3[%c0_3, %c0_4] : memref<1x32xf32, #tpu.memory_space<vmem>>, vector<1x32xf32>
    %4 = vector.broadcast %3 : vector<1x32xf32> to vector<8x32xf32>
    %5 = arith.addf %2, %4 : vector<8x32xf32>
    %cst_5 = arith.constant 0.000000e+00 : f32
    %6 = vector.broadcast %cst_5 : f32 to vector<8x32xf32>
    %7 = arith.maximumf %5, %6 : vector<8x32xf32>
    %c0_6 = arith.constant 0 : index
    %c0_7 = arith.constant 0 : index
    %8 = vector.load %arg4[%c0_6, %c0_7] : memref<32x32xf32, #tpu.memory_space<vmem>>, vector<32x32xf32>
    %cst_8 = arith.constant dense<0.000000e+00> : vector<8x32xf32>
    %9 = tpu.matmul %7, %8, %cst_8 {dimension_numbers = #tpu.dot_dimension_numbers<[1], [0], [0], [1], [0, 0, 1, 1], [], []>} : vector<8x32xf32>, vector<32x32xf32>, vector<8x32xf32> -> vector<8x32xf32>
    %c0_9 = arith.constant 0 : index
    %c0_10 = arith.constant 0 : index
    %10 = vector.load %arg5[%c0_9, %c0_10] : memref<1x32xf32, #tpu.memory_space<vmem>>, vector<1x32xf32>
    %11 = vector.broadcast %10 : vector<1x32xf32> to vector<8x32xf32>
    %12 = arith.addf %9, %11 : vector<8x32xf32>
    %cst_11 = arith.constant 0.000000e+00 : f32
    %13 = vector.broadcast %cst_11 : f32 to vector<8x32xf32>
    %14 = arith.maximumf %12, %13 : vector<8x32xf32>
    %15 = arith.addf %0, %14 : vector<8x32xf32>
    %cst_12 = arith.constant 0.000000e+00 : f32
    %16 = vector.broadcast %cst_12 : f32 to vector<8x32xf32>
    %17 = arith.maximumf %15, %16 : vector<8x32xf32>
    %c0_13 = arith.constant 0 : index
    %c0_14 = arith.constant 0 : index
    %18 = vector.load %arg6[%c0_13, %c0_14] : memref<32x16xf32, #tpu.memory_space<vmem>>, vector<32x16xf32>
    %cst_15 = arith.constant dense<0.000000e+00> : vector<8x16xf32>
    %19 = tpu.matmul %17, %18, %cst_15 {dimension_numbers = #tpu.dot_dimension_numbers<[1], [0], [0], [1], [0, 0, 1, 1], [], []>} : vector<8x32xf32>, vector<32x16xf32>, vector<8x16xf32> -> vector<8x16xf32>
    %c0_16 = arith.constant 0 : index
    %c0_17 = arith.constant 0 : index
    %20 = vector.load %arg7[%c0_16, %c0_17] : memref<1x16xf32, #tpu.memory_space<vmem>>, vector<1x16xf32>
    %21 = vector.broadcast %20 : vector<1x16xf32> to vector<8x16xf32>
    %22 = arith.addf %19, %21 : vector<8x16xf32>
    %cst_18 = arith.constant 0.000000e+00 : f32
    %23 = vector.broadcast %cst_18 : f32 to vector<8x16xf32>
    %24 = arith.maximumf %22, %23 : vector<8x16xf32>
    %c0_19 = arith.constant 0 : index
    %c0_20 = arith.constant 0 : index
    %25 = vector.load %arg8[%c0_19, %c0_20] : memref<8x16xf32, #tpu.memory_space<vmem>>, vector<8x16xf32>
    tpu.vector_store %arg8[%c0_19, %c0_20], %24 {strides = array<i32>} : memref<8x16xf32, #tpu.memory_space<vmem>>, vector<8x16xf32>,
    return
  }
  func.func @transform_0(%arg0: i32) -> (i32, i32) {
    %c0_i32 = arith.constant 0 : i32
    %c0_i32_0 = arith.constant 0 : i32
    return %arg0, %c0_i32 : i32, i32
  }
  func.func @transform_1(%arg0: i32) -> (i32, i32) {
    %c0_i32 = arith.constant 0 : i32
    %c0_i32_0 = arith.constant 0 : i32
    %c0_i32_1 = arith.constant 0 : i32
    return %c0_i32, %c0_i32_0 : i32, i32
  }
  func.func @transform_2(%arg0: i32) -> (i32, i32) {
    %c0_i32 = arith.constant 0 : i32
    %c0_i32_0 = arith.constant 0 : i32
    %c0_i32_1 = arith.constant 0 : i32
    return %c0_i32, %c0_i32_0 : i32, i32
  }
  func.func @transform_3(%arg0: i32) -> (i32, i32) {
    %c0_i32 = arith.constant 0 : i32
    %c0_i32_0 = arith.constant 0 : i32
    %c0_i32_1 = arith.constant 0 : i32
    return %c0_i32, %c0_i32_0 : i32, i32
  }
  func.func @transform_4(%arg0: i32) -> (i32, i32) {
    %c0_i32 = arith.constant 0 : i32
    %c0_i32_0 = arith.constant 0 : i32
    %c0_i32_1 = arith.constant 0 : i32
    return %c0_i32, %c0_i32_0 : i32, i32
  }
  func.func @transform_5(%arg0: i32) -> (i32, i32) {
    %c0_i32 = arith.constant 0 : i32
    %c0_i32_0 = arith.constant 0 : i32
    %c0_i32_1 = arith.constant 0 : i32
    return %c0_i32, %c0_i32_0 : i32, i32
  }
  func.func @transform_6(%arg0: i32) -> (i32, i32) {
    %c0_i32 = arith.constant 0 : i32
    %c0_i32_0 = arith.constant 0 : i32
    %c0_i32_1 = arith.constant 0 : i32
    return %c0_i32, %c0_i32_0 : i32, i32
  }
  func.func @transform_7(%arg0: i32) -> (i32, i32) {
    %c0_i32 = arith.constant 0 : i32
    %c0_i32_0 = arith.constant 0 : i32
    return %arg0, %c0_i32 : i32, i32
  }
}

</mosaic_0001>

<bundles_post_ra>
// kernel: resfc_forward.1
= control target key start
LH: loop header
LB: loop body
LE: loop exit
PB: predicated region body
PF: predicated region fallthrough
CT: control target
= control target key end

     0   :  { %12 = vsyncpa [#allocation3], 0  ;;  %s515_s0 = inlined_call_operand.vmem [shape: f32[8,32], index: 0, kind: input, shape index: {}]   ;;  %s516_s1 = inlined_call_operand.vmem [shape: f32[32,32], index: 1, kind: input, shape index: {}]   ;;  %s517_s2 = inlined_call_operand.vmem [shape: f32[1,32], index: 2, kind: input, shape index: {}]   ;;  %s518_s3 = inlined_call_operand.hbm [shape: f32[32,32], index: 3, kind: input, shape index: {}]   ;;  %s519_s4 = inlined_call_operand.vmem [shape: f32[1,32], index: 4, kind: input, shape index: {}]   ;;  %s520_s5 = inlined_call_operand.vmem [shape: f32[32,16], index: 5, kind: input, shape index: {}]   ;;  %s521_s6 = inlined_call_operand.vmem [shape: f32[1,16], index: 6, kind: input, shape index: {}]   ;;  %s522_s7 = inlined_call_operand.hbm [shape: f32[8,16], index: 7, kind: output, shape index: {}]  }
   0x1   :  { %13 = vsyncpa [#allocation4], 0  ;;  %s421_s24 = smov [#allocation2]  }
   0x2   :  { %s25_s25 = sshll.u32 %s421_s24, 4  ;;  %s26_s25 = int_to_ptr.vmem [resolvable:$true] %s25_s25 }
   0x3   :  { %s385_s26 = scalar_lea.vmem %s26_s25, 512  ;;  %p390_p1 = scmp.lt.s32.totalorder %s26_s25, %s26_s25 }
   0x4   :  { %p386_p0 = scmp.ne.s32.totalorder %s26_s25, %s385_s26  ;;  %p391_p2 = scmp.lt.s32.totalorder %s385_s26, %s385_s26 }
   0x6   :  { %p392_p3 = por %p391_p2, %p390_p1 }
   0x8   :  { %p393_p4 = pnand %p392_p3, %p386_p0 }
   0xa   :  { %396 = shalt.err (!%p393_p4)
}
   0xb   :  { %s422_s27 = smov 128   ;;  %s423_s28 = smov 8  }
   0xc   :  { %31 = dma.hbm_to_vmem [thread:$0]  %s518_s3, 512, %s26_s25, [#allocation3], %s422_s27, %s422_s27, %s423_s28  }
   0xd   :  { %417 = dma.done.wait [#allocation3], 512  }
   0xe   :  { %418 = vsyncadd [#allocation3], 4294966784  ;;  %v424_v0 = vmov 0.0   ;;  %vm425_vm0 = vmmov 0   ;;  %v45_v1 = vld [vmem:[%s516_s1 + $0x18] sm:$0xff]  ;;  %v44_v2 = vld [vmem:[%s516_s1 + $0x10] sm:$0xff] }
   0xf   :  { %338 = vmatprep.subr.mxu0 %v424_v0  ;;  %346 = vmatprep.mubr.msk.f32.mxu0 %vm425_vm0, %v424_v0  ;;  %v131_v3 = vld [vmem:[#allocation2 + $0x18] sm:$0xff]  ;;  %v43_v4 = vld [vmem:[%s516_s1 + $0x8] sm:$0xff]  ;;  %v42_v5 = vld [vmem:[%s516_s1] sm:$0xff]  ;;  %vm53_vm1 = vcmask 261120   ;;  %s426_s28 = smov [#allocation5]   ;;  %vm300_vm2 = vcmask 130048  }
  0x10   :  { %349 = vmatprep.subr.mxu1 %v424_v0  ;;  %357 = vmatprep.mubr.msk.f32.mxu1 %vm425_vm0, %v424_v0  ;;  %v41_v6 = vld [vmem:[%s515_s0] sm:$0xff]  ;;  %v130_v7 = vld [vmem:[#allocation2 + $0x10] sm:$0xff]  ;;  %v129_v8 = vld [vmem:[#allocation2 + $0x8] sm:$0xff] }
  0x11   :  { %339 = vmatpush3.msra.mxu0 %v45_v1  ;;  %350 = vmatpush3.msra.mxu1 %v131_v3  ;;  %v128_v9 = vld [vmem:[#allocation2] sm:$0xff]  ;;  %v218_v15 = vld [vmem:[%s520_s5 + $0x18] sm:$0xff]  ;;  %v217_v16 = vld [vmem:[%s520_s5 + $0x10] sm:$0xff] }
  0x12   :  { %340 = vmatprep.subr.mxu0 %v424_v0  ;;  %351 = vmatprep.subr.mxu1 %v424_v0  ;;  %v317_v10 = vld [vmem:[%s517_s2] ss:$0 sm:$0xff]  ;;  %v216_v17 = vld [vmem:[%s520_s5 + $0x8] sm:$0xff] }
  0x13   :  { %341 = vmatpush3.msra.mxu0 %v44_v2  ;;  %352 = vmatpush3.msra.mxu1 %v130_v7  ;;  %v215_v18 = vld [vmem:[%s520_s5] sm:$0xff]  ;;  %s308_s5 = sshll.u32 %s426_s28, 4  ;;  %s309_s5 = int_to_ptr.vmem [resolvable:$true] %s308_s5 }
  0x14   :  { %342 = vmatprep.subr.mxu0 %v424_v0  ;;  %353 = vmatprep.subr.mxu1 %v424_v0  ;;  %v319_v19 = vld [vmem:[%s519_s4] ss:$0 sm:$0xff]  ;;  %s397_s4 = scalar_lea.vmem %s309_s5, 128  ;;  %p402_p6 = scmp.lt.s32.totalorder %s309_s5, %s309_s5 }
  0x15   :  { %343 = vmatpush3.msra.mxu0 %v43_v4  ;;  %354 = vmatpush3.msra.mxu1 %v129_v8  ;;  %v321_v26 = vld [vmem:[%s521_s6] ss:$0 sm:$0xff]  ;;  %p398_p5 = scmp.ne.s32.totalorder %s309_s5, %s397_s4  ;;  %p403_p7 = scmp.lt.s32.totalorder %s397_s4, %s397_s4 }
  0x16   :  { %344 = vmatprep.subr.mxu0 %v424_v0  ;;  %355 = vmatprep.subr.mxu1 %v424_v0 }
  0x17   :  { %345 = vmatpush3.msra.mxu0 %v42_v5  ;;  %356 = vmatpush3.msra.mxu1 %v128_v9  ;;  %p404_p8 = por %p403_p7, %p402_p6 }
  0x18   :  { %347 = vmatmul.mubr.msk.f32.vlgmr.msra.gmra.mxu0 %vm53_vm1, %v41_v6  ;;  %360 = vmatprep.subr.mxu0 %v424_v0 }
  0x19   :  { %368 = vmatprep.mubr.msk.f32.mxu0 %vm425_vm0, %v424_v0  ;;  %361 = vmatpush3.msra.mxu0 %v218_v15  ;;  %p405_p9 = pnand %p404_p8, %p398_p5 }
  0x1a   :  { %362 = vmatprep.subr.mxu0 %v424_v0 }
  0x1b   :  { %363 = vmatpush3.msra.mxu0 %v217_v16 }
  0x1c   :  { %364 = vmatprep.subr.mxu0 %v424_v0 }
  0x1d   :  { %365 = vmatpush3.msra.mxu0 %v216_v17 }
  0x1e   :  { %366 = vmatprep.subr.mxu0 %v424_v0 }
  0x1f   :  { %367 = vmatpush3.msra.mxu0 %v215_v18 }
  0xd8   :  { %v123_v11 = vpop.f32.mrf.mxu0 }
  0xd9   :  { %v124_v12 = vadd.f32 %v317_v10, %v123_v11 }
  0xda   :  { %v348_v13 = vpop.f32.mrf.mxu0 }
  0xdb   :  { %v127_v14 = vmax.f32 %v124_v12, 0.0 }
  0xdd   :  { %358 = vmatmul.mubr.msk.f32.vlgmr.msra.gmra.mxu1 %vm53_vm1, %v127_v14 }
 0x19d   :  { %v208_v20 = vpop.f32.mrf.mxu1 }
 0x19e   :  { %v209_v21 = vadd.f32 %v319_v19, %v208_v20 }
 0x19f   :  { %v359_v22 = vpop.f32.mrf.mxu1 }
 0x1a0   :  { %v212_v23 = vmax.f32 %v209_v21, 0.0 }
 0x1a2   :  { %v213_v24 = vadd.f32 %v212_v23, %v41_v6 }
 0x1a4   :  { %v214_v25 = vmax.f32 %v213_v24, 0.0 }
 0x1a6   :  { %369 = vmatmul.mubr.msk.f32.vlgmr.msra.gmra.mxu0 %vm53_vm1, %v214_v25 }
 0x266   :  { %v295_v27 = vpop.f32.mrf.mxu0 }
 0x267   :  { %v296_v28 = vadd.f32 %v321_v26, %v295_v27 }
 0x268   :  { %v370_v29 = vpop.f32.mrf.mxu0 }
 0x269   :  { %v299_v30 = vmax.f32 %v296_v28, 0.0 }
 0x26b   :  { %301 = vst.msk [vmem:[#allocation5] sm:$0xff] %vm300_vm2, %v299_v30 }
 0x26c   :  { %408 = shalt.err (!%p405_p9)
}
 0x26d   :  { %311 = dma.vmem_to_hbm [thread:$0]  %s309_s5, 128, %s522_s7, [#allocation4]  }
 0x26e   :  { %419 = dma.done.wait [#allocation4], 128  }
 0x26f   :  { %420 = vsyncadd [#allocation4], 4294967168 }
 0x270   :  { %315 = vsyncpa [#allocation3], 1 }
 0x271   :  { %316 = vsyncpa [#allocation4], 1 }

</bundles_post_ra>
